<compile_context>
chip_gen: v5e
topology: v5e:2x2
jax: 0.10.0
libtpu: 0.0.40
codegen_flags: <defaults>
</compile_context>

<pallas_src>
import functools

import jax
import jax.numpy as jnp
from jax.experimental import pallas as pl
from jax.experimental.pallas import tpu as pltpu


def _round_up(x, m):
    return (x + m - 1) // m * m


def _prelu(h, alpha_row):
    # PyTorch PReLU: max(0, x) + alpha * min(0, x)  (per-channel alpha), f32 VPU math.
    return jnp.where(h >= 0, h, alpha_row * h)


def bayes_mlp_kernel(
    x_ref,                       # (row_tile, ninp)   matmul_dtype
    w1_ref, b1_ref, a1_ref,      # (ninp, 512) md, (1, 512) f32, (1, 512) f32
    w2_ref, b2_ref, a2_ref,      # (512, 256)  md, (1, 256) f32, (1, 256) f32
    w3_ref, b3_ref, a3_ref,      # (256, npad) md, (1, npad) f32, (1, npad) f32
    w4_ref, b4_ref,              # (npad, npad) md, (1, npad) f32
    o_ref,                       # (row_tile, npad) f32  (lane-dense)
    *, matmul_dtype,
):
    def dense(h, w_ref, b_ref):
        # bf16 (or f32) operands on the MXU, f32 accumulation, f32 bias add.
        return jnp.dot(h.astype(matmul_dtype), w_ref[...],
                       preferred_element_type=jnp.float32) + b_ref[...]

    h = _prelu(dense(x_ref[...], w1_ref, b1_ref), a1_ref[...])
    h = _prelu(dense(h, w2_ref, b2_ref), a2_ref[...])
    h = _prelu(dense(h, w3_ref, b3_ref), a3_ref[...])
    o_ref[...] = dense(h, w4_ref, b4_ref).astype(o_ref.dtype)


def bayes_mlp_forward(x, params, *, bbb_nsegments, row_tile=None,
                      matmul_dtype=jnp.bfloat16):
    """x: (batch, num_segments, ninp) f32 -> (n_chunks, bbb_nsegments, nout) f32."""
    batch, num_segments, ninp = x.shape
    total_rows = batch * num_segments
    assert total_rows % bbb_nsegments == 0, (
        "total rows must be divisible by bbb_nsegments (the PyTorch code would "
        "otherwise fail on the ragged last chunk)")
    n_chunks = total_rows // bbb_nsegments

    (w1, b1, a1, w2, b2, a2, w3, b3, a3, w4, b4) = params
    nout = w4.shape[1]
    h1, h2 = w1.shape[1], w2.shape[1]

    # --- lane-dense tail: pad layer-3/4 output width to a multiple of 128 ---
    npad = _round_up(nout, 128)
    pad_n = npad - nout
    w3p = jnp.pad(w3, ((0, 0), (0, pad_n)))
    b3p = jnp.pad(b3, ((0, 0), (0, pad_n)))
    a3p = jnp.pad(a3, ((0, 0), (0, pad_n)))
    w4p = jnp.pad(w4, ((0, pad_n), (0, pad_n)))
    b4p = jnp.pad(b4, ((0, 0), (0, pad_n)))

    # --- cast matmul operands once in the wrapper (halves weight / x DMA) ---
    w1c = w1.astype(matmul_dtype)
    w2c = w2.astype(matmul_dtype)
    w3c = w3p.astype(matmul_dtype)
    w4c = w4p.astype(matmul_dtype)

    # --- flatten + row tiling (the per-chunk split is just a reshape) ---
    x2 = x.reshape(total_rows, ninp).astype(matmul_dtype)
    if row_tile is None:
        row_tile = min(512, _round_up(total_rows, 8))
    assert row_tile % 8 == 0, "row_tile must be a multiple of 8"
    padded_rows = _round_up(total_rows, row_tile)
    if padded_rows != total_rows:
        x2 = jnp.pad(x2, ((0, padded_rows - total_rows), (0, 0)))
    grid = (padded_rows // row_tile,)

    full = lambda i: (0, 0)

    out = pl.pallas_call(
        functools.partial(bayes_mlp_kernel, matmul_dtype=matmul_dtype),
        out_shape=jax.ShapeDtypeStruct((padded_rows, npad), jnp.float32),
        grid_spec=pltpu.PrefetchScalarGridSpec(
            num_scalar_prefetch=0,
            grid=grid,
            in_specs=[
                pl.BlockSpec((row_tile, ninp), lambda i: (i, 0)),
                pl.BlockSpec((ninp, h1), full),    # weights: constant index_map
                pl.BlockSpec((1, h1), full),       # -> DMA'd once, reused across steps
                pl.BlockSpec((1, h1), full),
                pl.BlockSpec((h1, h2), full),
                pl.BlockSpec((1, h2), full),
                pl.BlockSpec((1, h2), full),
                pl.BlockSpec((h2, npad), full),
                pl.BlockSpec((1, npad), full),
                pl.BlockSpec((1, npad), full),
                pl.BlockSpec((npad, npad), full),
                pl.BlockSpec((1, npad), full),
            ],
            out_specs=pl.BlockSpec((row_tile, npad), lambda i: (i, 0)),
        ),
        compiler_params=pltpu.CompilerParams(
            dimension_semantics=("parallel",)),   # shards row tiles across v7x's 2 TCs
    )(x2, w1c, b1, a1, w2c, b2, a2, w3c, b3p, a3p, w4c, b4p)

    out = out[:total_rows, :nout]
    return out.reshape(n_chunks, bbb_nsegments, nout)


def init_params(key, ninp, nout, post_mu_init=(-0.1, 0.1)):
    """Deterministic init matching BayesMLP shapes (eval path uses the mu's).

    nneurons = [512, 256, nout] as hard-coded in the module.
    Linear weights are stored TRANSPOSED vs PyTorch, i.e. (in, out), so the
    kernel computes y = x @ W + b.  PReLU slopes default to 0.25."""
    nneurons = [512, 256, nout]
    lo, hi = post_mu_init
    keys = jax.random.split(key, 8)

    def lin(kw, kb, fan_in, fan_out):
        w_mu = jax.random.uniform(kw, (fan_out, fan_in), jnp.float32, lo, hi)
        b_mu = jax.random.uniform(kb, (fan_out,), jnp.float32, lo, hi)
        return w_mu.T, b_mu.reshape(1, fan_out)

    w1, b1 = lin(keys[0], keys[1], ninp, nneurons[0])
    w2, b2 = lin(keys[2], keys[3], nneurons[0], nneurons[1])
    w3, b3 = lin(keys[4], keys[5], nneurons[1], nneurons[2])
    w4, b4 = lin(keys[6], keys[7], nneurons[2], nout)

    a1 = jnp.full((1, nneurons[0]), 0.25, jnp.float32)
    a2 = jnp.full((1, nneurons[1]), 0.25, jnp.float32)
    a3 = jnp.full((1, nneurons[2]), 0.25, jnp.float32)

    return (w1, b1, a1, w2, b2, a2, w3, b3, a3, w4, b4)


def reference_forward(x, params, *, bbb_nsegments, matmul_dtype=jnp.bfloat16):
    """Pure-JAX reference with the same matmul operand precision as the kernel."""
    (w1, b1, a1, w2, b2, a2, w3, b3, a3, w4, b4) = params
    batch, num_segments, ninp = x.shape
    nout = w4.shape[1]
    total = batch * num_segments
    xr = x.reshape(total, ninp)

    def dense(h, w, b):
        return jnp.dot(h.astype(matmul_dtype), w.astype(matmul_dtype),
                       preferred_element_type=jnp.float32) + b

    def prelu(h, a):
        return jnp.where(h >= 0, h, a * h)

    h = prelu(dense(xr, w1, b1), a1)
    h = prelu(dense(h, w2, b2), a2)
    h = prelu(dense(h, w3, b3), a3)
    y = dense(h, w4, b4)
    return y.reshape(total // bbb_nsegments, bbb_nsegments, nout)


if __name__ == "__main__":
    # Small shapes consistent with the module (hidden sizes 512/256 are fixed):
    #   x: (batch=3, num_segments=4, ninp=256), bbb_nsegments=4 -> 3 chunks of 4 rows.
    # 12 total rows also exercises the row-padding path (padded to a multiple of 8).
    ninp, nout, bbb_nsegments = 256, 2, 4
    batch, num_segments = 3, 4

    key = jax.random.PRNGKey(0)
    kx, kp = jax.random.split(key)
    x = jax.random.normal(kx, (batch, num_segments, ninp), jnp.float32)
    params = init_params(kp, ninp, nout)

    ref_bf16 = reference_forward(x, params, bbb_nsegments=bbb_nsegments,
                                 matmul_dtype=jnp.bfloat16)
    ref_f32 = reference_forward(x, params, bbb_nsegments=bbb_nsegments,
                                matmul_dtype=jnp.float32)

    # Default path: auto row tile (single step here; 512-row tiles at scale).
    fwd = jax.jit(functools.partial(bayes_mlp_forward, bbb_nsegments=bbb_nsegments))
    out = jax.block_until_ready(fwd(x, params))
    n_chunks = batch * num_segments // bbb_nsegments
    assert out.shape == (n_chunks, bbb_nsegments, nout)
    assert jnp.allclose(out, ref_bf16, atol=1e-3, rtol=1e-3), "mismatch vs bf16 reference"
    assert jnp.allclose(out, ref_f32, atol=1e-2, rtol=1e-2), "mismatch vs f32 reference"

    # Forced small row tile -> multi-step grid + row padding, same result.
    fwd_tiled = jax.jit(functools.partial(
        bayes_mlp_forward, bbb_nsegments=bbb_nsegments, row_tile=8))
    out2 = jax.block_until_ready(fwd_tiled(x, params))
    assert jnp.allclose(out2, ref_bf16, atol=1e-3, rtol=1e-3), "mismatch (tiled grid)"

    print("KERNEL_OK")
</pallas_src>

<mosaic_0001>
module attributes {stable_mosaic.version = 11 : i64} {
  func.func @bayes_mlp_kernel(%arg0: i32, %arg1: memref<16x256xbf16, #tpu.memory_space<vmem>>, %arg2: memref<256x512xbf16, #tpu.memory_space<vmem>>, %arg3: memref<1x512xf32, #tpu.memory_space<vmem>>, %arg4: memref<1x512xf32, #tpu.memory_space<vmem>>, %arg5: memref<512x256xbf16, #tpu.memory_space<vmem>>, %arg6: memref<1x256xf32, #tpu.memory_space<vmem>>, %arg7: memref<1x256xf32, #tpu.memory_space<vmem>>, %arg8: memref<256x128xbf16, #tpu.memory_space<vmem>>, %arg9: memref<1x128xf32, #tpu.memory_space<vmem>>, %arg10: memref<1x128xf32, #tpu.memory_space<vmem>>, %arg11: memref<128x128xbf16, #tpu.memory_space<vmem>>, %arg12: memref<1x128xf32, #tpu.memory_space<vmem>>, %arg13: memref<16x128xf32, #tpu.memory_space<vmem>>) attributes {dimension_semantics = [#tpu.dimension_semantics<parallel>], iteration_bounds = array<i64: 1>, scalar_prefetch = 0 : i64, scratch_operands = 0 : i64, tpu.core_type = #tpu.core_type<tc>, window_params = [{transform_indices = @transform_0, window_bounds = array<i64: 16, 256>}, {pipeline_mode = #tpu.pipeline_mode<synchronous>, transform_indices = @transform_1, window_bounds = array<i64: 256, 512>}, {pipeline_mode = #tpu.pipeline_mode<synchronous>, transform_indices = @transform_2, window_bounds = array<i64: 1, 512>}, {pipeline_mode = #tpu.pipeline_mode<synchronous>, transform_indices = @transform_3, window_bounds = array<i64: 1, 512>}, {pipeline_mode = #tpu.pipeline_mode<synchronous>, transform_indices = @transform_4, window_bounds = array<i64: 512, 256>}, {pipeline_mode = #tpu.pipeline_mode<synchronous>, transform_indices = @transform_5, window_bounds = array<i64: 1, 256>}, {pipeline_mode = #tpu.pipeline_mode<synchronous>, transform_indices = @transform_6, window_bounds = array<i64: 1, 256>}, {pipeline_mode = #tpu.pipeline_mode<synchronous>, transform_indices = @transform_7, window_bounds = array<i64: 256, 128>}, {pipeline_mode = #tpu.pipeline_mode<synchronous>, transform_indices = @transform_8, window_bounds = array<i64: 1, 128>}, {pipeline_mode = #tpu.pipeline_mode<synchronous>, transform_indices = @transform_9, window_bounds = array<i64: 1, 128>}, {pipeline_mode = #tpu.pipeline_mode<synchronous>, transform_indices = @transform_10, window_bounds = array<i64: 128, 128>}, {pipeline_mode = #tpu.pipeline_mode<synchronous>, transform_indices = @transform_11, window_bounds = array<i64: 1, 128>}, {transform_indices = @transform_12, window_bounds = array<i64: 16, 128>}]} {
    %c0 = arith.constant 0 : index
    %c0_0 = arith.constant 0 : index
    %0 = vector.load %arg1[%c0, %c0_0] : memref<16x256xbf16, #tpu.memory_space<vmem>>, vector<16x256xbf16>
    %c0_1 = arith.constant 0 : index
    %c0_2 = arith.constant 0 : index
    %1 = vector.load %arg2[%c0_1, %c0_2] : memref<256x512xbf16, #tpu.memory_space<vmem>>, vector<256x512xbf16>
    %cst = arith.constant dense<0.000000e+00> : vector<16x512xf32>
    %2 = tpu.matmul %0, %1, %cst {dimension_numbers = #tpu.dot_dimension_numbers<[1], [0], [0], [1], [0, 0, 1, 1], [], []>} : vector<16x256xbf16>, vector<256x512xbf16>, vector<16x512xf32> -> vector<16x512xf32>
    %c0_3 = arith.constant 0 : index
    %c0_4 = arith.constant 0 : index
    %3 = vector.load %arg3[%c0_3, %c0_4] : memref<1x512xf32, #tpu.memory_space<vmem>>, vector<1x512xf32>
    %4 = vector.broadcast %3 : vector<1x512xf32> to vector<16x512xf32>
    %5 = arith.addf %2, %4 : vector<16x512xf32>
    %c0_5 = arith.constant 0 : index
    %c0_6 = arith.constant 0 : index
    %6 = vector.load %arg4[%c0_5, %c0_6] : memref<1x512xf32, #tpu.memory_space<vmem>>, vector<1x512xf32>
    %cst_7 = arith.constant 0.000000e+00 : f32
    %7 = vector.broadcast %cst_7 : f32 to vector<16x512xf32>
    %8 = arith.cmpf oge, %5, %7 : vector<16x512xf32>
    %9 = vector.broadcast %6 : vector<1x512xf32> to vector<16x512xf32>
    %10 = arith.mulf %9, %5 : vector<16x512xf32>
    %11 = arith.select %8, %5, %10 : vector<16x512xi1>, vector<16x512xf32>
    %12 = arith.truncf %11 : vector<16x512xf32> to vector<16x512xbf16>
    %c0_8 = arith.constant 0 : index
    %c0_9 = arith.constant 0 : index
    %13 = vector.load %arg5[%c0_8, %c0_9] : memref<512x256xbf16, #tpu.memory_space<vmem>>, vector<512x256xbf16>
    %cst_10 = arith.constant dense<0.000000e+00> : vector<16x256xf32>
    %14 = tpu.matmul %12, %13, %cst_10 {dimension_numbers = #tpu.dot_dimension_numbers<[1], [0], [0], [1], [0, 0, 1, 1], [], []>} : vector<16x512xbf16>, vector<512x256xbf16>, vector<16x256xf32> -> vector<16x256xf32>
    %c0_11 = arith.constant 0 : index
    %c0_12 = arith.constant 0 : index
    %15 = vector.load %arg6[%c0_11, %c0_12] : memref<1x256xf32, #tpu.memory_space<vmem>>, vector<1x256xf32>
    %16 = vector.broadcast %15 : vector<1x256xf32> to vector<16x256xf32>
    %17 = arith.addf %14, %16 : vector<16x256xf32>
    %c0_13 = arith.constant 0 : index
    %c0_14 = arith.constant 0 : index
    %18 = vector.load %arg7[%c0_13, %c0_14] : memref<1x256xf32, #tpu.memory_space<vmem>>, vector<1x256xf32>
    %cst_15 = arith.constant 0.000000e+00 : f32
    %19 = vector.broadcast %cst_15 : f32 to vector<16x256xf32>
    %20 = arith.cmpf oge, %17, %19 : vector<16x256xf32>
    %21 = vector.broadcast %18 : vector<1x256xf32> to vector<16x256xf32>
    %22 = arith.mulf %21, %17 : vector<16x256xf32>
    %23 = arith.select %20, %17, %22 : vector<16x256xi1>, vector<16x256xf32>
    %24 = arith.truncf %23 : vector<16x256xf32> to vector<16x256xbf16>
    %c0_16 = arith.constant 0 : index
    %c0_17 = arith.constant 0 : index
    %25 = vector.load %arg8[%c0_16, %c0_17] : memref<256x128xbf16, #tpu.memory_space<vmem>>, vector<256x128xbf16>
    %cst_18 = arith.constant dense<0.000000e+00> : vector<16x128xf32>
    %26 = tpu.matmul %24, %25, %cst_18 {dimension_numbers = #tpu.dot_dimension_numbers<[1], [0], [0], [1], [0, 0, 1, 1], [], []>} : vector<16x256xbf16>, vector<256x128xbf16>, vector<16x128xf32> -> vector<16x128xf32>
    %c0_19 = arith.constant 0 : index
    %c0_20 = arith.constant 0 : index
    %27 = vector.load %arg9[%c0_19, %c0_20] : memref<1x128xf32, #tpu.memory_space<vmem>>, vector<1x128xf32>
    %28 = vector.broadcast %27 : vector<1x128xf32> to vector<16x128xf32>
    %29 = arith.addf %26, %28 : vector<16x128xf32>
    %c0_21 = arith.constant 0 : index
    %c0_22 = arith.constant 0 : index
    %30 = vector.load %arg10[%c0_21, %c0_22] : memref<1x128xf32, #tpu.memory_space<vmem>>, vector<1x128xf32>
    %cst_23 = arith.constant 0.000000e+00 : f32
    %31 = vector.broadcast %cst_23 : f32 to vector<16x128xf32>
    %32 = arith.cmpf oge, %29, %31 : vector<16x128xf32>
    %33 = vector.broadcast %30 : vector<1x128xf32> to vector<16x128xf32>
    %34 = arith.mulf %33, %29 : vector<16x128xf32>
    %35 = arith.select %32, %29, %34 : vector<16x128xi1>, vector<16x128xf32>
    %36 = arith.truncf %35 : vector<16x128xf32> to vector<16x128xbf16>
    %c0_24 = arith.constant 0 : index
    %c0_25 = arith.constant 0 : index
    %37 = vector.load %arg11[%c0_24, %c0_25] : memref<128x128xbf16, #tpu.memory_space<vmem>>, vector<128x128xbf16>
    %cst_26 = arith.constant dense<0.000000e+00> : vector<16x128xf32>
    %38 = tpu.matmul %36, %37, %cst_26 {dimension_numbers = #tpu.dot_dimension_numbers<[1], [0], [0], [1], [0, 0, 1, 1], [], []>} : vector<16x128xbf16>, vector<128x128xbf16>, vector<16x128xf32> -> vector<16x128xf32>
    %c0_27 = arith.constant 0 : index
    %c0_28 = arith.constant 0 : index
    %39 = vector.load %arg12[%c0_27, %c0_28] : memref<1x128xf32, #tpu.memory_space<vmem>>, vector<1x128xf32>
    %40 = vector.broadcast %39 : vector<1x128xf32> to vector<16x128xf32>
    %41 = arith.addf %38, %40 : vector<16x128xf32>
    %c0_29 = arith.constant 0 : index
    %c0_30 = arith.constant 0 : index
    %42 = vector.load %arg13[%c0_29, %c0_30] : memref<16x128xf32, #tpu.memory_space<vmem>>, vector<16x128xf32>
    tpu.vector_store %arg13[%c0_29, %c0_30], %41 {strides = array<i32>} : memref<16x128xf32, #tpu.memory_space<vmem>>, vector<16x128xf32>,
    return
  }
  func.func @transform_0(%arg0: i32) -> (i32, i32) {
    %c0_i32 = arith.constant 0 : i32
    %c0_i32_0 = arith.constant 0 : i32
    return %arg0, %c0_i32 : i32, i32
  }
  func.func @transform_1(%arg0: i32) -> (i32, i32) {
    %c0_i32 = arith.constant 0 : i32
    %c0_i32_0 = arith.constant 0 : i32
    %c0_i32_1 = arith.constant 0 : i32
    return %c0_i32, %c0_i32_0 : i32, i32
  }
  func.func @transform_2(%arg0: i32) -> (i32, i32) {
    %c0_i32 = arith.constant 0 : i32
    %c0_i32_0 = arith.constant 0 : i32
    %c0_i32_1 = arith.constant 0 : i32
    return %c0_i32, %c0_i32_0 : i32, i32
  }
  func.func @transform_3(%arg0: i32) -> (i32, i32) {
    %c0_i32 = arith.constant 0 : i32
    %c0_i32_0 = arith.constant 0 : i32
    %c0_i32_1 = arith.constant 0 : i32
    return %c0_i32, %c0_i32_0 : i32, i32
  }
  func.func @transform_4(%arg0: i32) -> (i32, i32) {
    %c0_i32 = arith.constant 0 : i32
    %c0_i32_0 = arith.constant 0 : i32
    %c0_i32_1 = arith.constant 0 : i32
    return %c0_i32, %c0_i32_0 : i32, i32
  }
  func.func @transform_5(%arg0: i32) -> (i32, i32) {
    %c0_i32 = arith.constant 0 : i32
    %c0_i32_0 = arith.constant 0 : i32
    %c0_i32_1 = arith.constant 0 : i32
    return %c0_i32, %c0_i32_0 : i32, i32
  }
  func.func @transform_6(%arg0: i32) -> (i32, i32) {
    %c0_i32 = arith.constant 0 : i32
    %c0_i32_0 = arith.constant 0 : i32
    %c0_i32_1 = arith.constant 0 : i32
    return %c0_i32, %c0_i32_0 : i32, i32
  }
  func.func @transform_7(%arg0: i32) -> (i32, i32) {
    %c0_i32 = arith.constant 0 : i32
    %c0_i32_0 = arith.constant 0 : i32
    %c0_i32_1 = arith.constant 0 : i32
    return %c0_i32, %c0_i32_0 : i32, i32
  }
  func.func @transform_8(%arg0: i32) -> (i32, i32) {
    %c0_i32 = arith.constant 0 : i32
    %c0_i32_0 = arith.constant 0 : i32
    %c0_i32_1 = arith.constant 0 : i32
    return %c0_i32, %c0_i32_0 : i32, i32
  }
  func.func @transform_9(%arg0: i32) -> (i32, i32) {
    %c0_i32 = arith.constant 0 : i32
    %c0_i32_0 = arith.constant 0 : i32
    %c0_i32_1 = arith.constant 0 : i32
    return %c0_i32, %c0_i32_0 : i32, i32
  }
  func.func @transform_10(%arg0: i32) -> (i32, i32) {
    %c0_i32 = arith.constant 0 : i32
    %c0_i32_0 = arith.constant 0 : i32
    %c0_i32_1 = arith.constant 0 : i32
    return %c0_i32, %c0_i32_0 : i32, i32
  }
  func.func @transform_11(%arg0: i32) -> (i32, i32) {
    %c0_i32 = arith.constant 0 : i32
    %c0_i32_0 = arith.constant 0 : i32
    %c0_i32_1 = arith.constant 0 : i32
    return %c0_i32, %c0_i32_0 : i32, i32
  }
  func.func @transform_12(%arg0: i32) -> (i32, i32) {
    %c0_i32 = arith.constant 0 : i32
    %c0_i32_0 = arith.constant 0 : i32
    return %arg0, %c0_i32 : i32, i32
  }
}

</mosaic_0001>

<bundles_post_ra>
// kernel: bayes_mlp_forward.1
= control target key start
LH: loop header
LB: loop body
LE: loop exit
PB: predicated region body
PF: predicated region fallthrough
CT: control target
= control target key end

     0   :  { %s3119_s1 = inlined_call_operand.vmem [shape: bf16[256,512], index: 1, kind: input, shape index: {}]   ;;  %s3120_s0 = inlined_call_operand.vmem [shape: bf16[16,256], index: 0, kind: input, shape index: {}]   ;;  %s3121_s4 = inlined_call_operand.vmem [shape: bf16[512,256], index: 4, kind: input, shape index: {}]   ;;  %s3122_s2 = inlined_call_operand.vmem [shape: f32[1,512], index: 2, kind: input, shape index: {}]   ;;  %s3123_s3 = inlined_call_operand.vmem [shape: f32[1,512], index: 3, kind: input, shape index: {}]   ;;  %s3124_s8 = inlined_call_operand.vmem [shape: f32[1,128], index: 8, kind: input, shape index: {}]   ;;  %s3125_s7 = inlined_call_operand.vmem [shape: bf16[256,128], index: 7, kind: input, shape index: {}]   ;;  %s3126_s5 = inlined_call_operand.vmem [shape: f32[1,256], index: 5, kind: input, shape index: {}]   ;;  %s3127_s6 = inlined_call_operand.vmem [shape: f32[1,256], index: 6, kind: input, shape index: {}]   ;;  %s3128_s9 = inlined_call_operand.vmem [shape: f32[1,128], index: 9, kind: input, shape index: {}]   ;;  %s3129_s11 = inlined_call_operand.vmem [shape: f32[1,128], index: 11, kind: input, shape index: {}]   ;;  %s3130_s10 = inlined_call_operand.vmem [shape: bf16[128,128], index: 10, kind: input, shape index: {}]   ;;  %s3131_s12 = inlined_call_operand.vmem [shape: f32[16,128], index: 12, kind: output, shape index: {}]  }
   0x1   :  { %v1500_v0 = vld [vmem:[%s3119_s1 + $0xe0] sm:$0xf]  ;;  %v2026_v1 = vld [vmem:[%s3119_s1 + $0xec] sm:$0xf0]  ;;  %v2024_v5 = vld [vmem:[%s3119_s1 + $0xe4] sm:$0xf] }
   0x2   :  { %v1628_v2 = vld [vmem:[%s3119_s1 + $0x1e0] sm:$0xf]  ;;  %v1501_v3 = vor.u32 %v2026_v1, %v1500_v0  ;;  %v2058_v4 = vld [vmem:[%s3119_s1 + $0x1ec] sm:$0xf0]  ;;  %v1502_v6 = vld [vmem:[%s3119_s1 + $0xf0] sm:$0xf0] }
   0x3   :  { %v1629_v7 = vor.u32 %v2058_v4, %v1628_v2  ;;  %v1505_v8 = vor.u32 %v2024_v5, %v1502_v6  ;;  %v2056_v9 = vld [vmem:[%s3119_s1 + $0x1e4] sm:$0xf]  ;;  %v1630_v10 = vld [vmem:[%s3119_s1 + $0x1f0] sm:$0xf0]  ;;  %v1484_v11 = vld [vmem:[%s3119_s1 + $0xc0] sm:$0xf] }
   0x4   :  { %447 = vmatpush.bf16.msra.mxu0 %v1501_v3  ;;  %v1633_v12 = vor.u32 %v2056_v9, %v1630_v10  ;;  %v2022_v13 = vld [vmem:[%s3119_s1 + $0xcc] sm:$0xf0]  ;;  %v1612_v14 = vld [vmem:[%s3119_s1 + $0x1c0] sm:$0xf]  ;;  %v2020_v18 = vld [vmem:[%s3119_s1 + $0xc4] sm:$0xf] }
   0x5   :  { %v2054_v15 = vld [vmem:[%s3119_s1 + $0x1cc] sm:$0xf0]  ;;  %461 = vmatpush.bf16.msra.mxu1 %v1629_v7  ;;  %475 = vmatpush.bf16.msra.mxu2 %v1505_v8  ;;  %v1485_v16 = vor.u32 %v2022_v13, %v1484_v11  ;;  %v1486_v19 = vld [vmem:[%s3119_s1 + $0xd0] sm:$0xf0]  ;;  %v2052_v20 = vld [vmem:[%s3119_s1 + $0x1c4] sm:$0xf] }
   0x6   :  { %v1613_v17 = vor.u32 %v2054_v15, %v1612_v14  ;;  %489 = vmatpush.bf16.msra.mxu3 %v1633_v12  ;;  %v1489_v21 = vor.u32 %v2020_v18, %v1486_v19  ;;  %v1614_v22 = vld [vmem:[%s3119_s1 + $0x1d0] sm:$0xf0]  ;;  %v1468_v23 = vld [vmem:[%s3119_s1 + $0xa0] sm:$0xf]  ;;  %v2018_v24 = vld [vmem:[%s3119_s1 + $0xac] sm:$0xf0] }
   0x7   :  { %v1617_v25 = vor.u32 %v2052_v20, %v1614_v22  ;;  %v1596_v26 = vld [vmem:[%s3119_s1 + $0x1a0] sm:$0xf]  ;;  %v2050_v27 = vld [vmem:[%s3119_s1 + $0x1ac] sm:$0xf0]  ;;  %v2016_v28 = vld [vmem:[%s3119_s1 + $0xa4] sm:$0xf]  ;;  %v1469_v29 = vor.u32 %v2018_v24, %v1468_v23 }
   0x8   :  { %448 = vmatpush.bf16.msra.mxu0 %v1485_v16  ;;  %v1470_v30 = vld [vmem:[%s3119_s1 + $0xb0] sm:$0xf0]  ;;  %v2048_v31 = vld [vmem:[%s3119_s1 + $0x1a4] sm:$0xf]  ;;  %v1597_v33 = vor.u32 %v2050_v27, %v1596_v26  ;;  %v1452_v35 = vld [vmem:[%s3119_s1 + $0x80] sm:$0xf] }
   0x9   :  { %v1598_v32 = vld [vmem:[%s3119_s1 + $0x1b0] sm:$0xf0]  ;;  %462 = vmatpush.bf16.msra.mxu1 %v1613_v17  ;;  %476 = vmatpush.bf16.msra.mxu2 %v1489_v21  ;;  %v1473_v34 = vor.u32 %v2016_v28, %v1470_v30  ;;  %v2014_v36 = vld [vmem:[%s3119_s1 + $0x8c] sm:$0xf0]  ;;  %v1580_v37 = vld [vmem:[%s3119_s1 + $0x180] sm:$0xf] }
   0xa   :  { %490 = vmatpush.bf16.msra.mxu3 %v1617_v25  ;;  %v1601_v38 = vor.u32 %v2048_v31, %v1598_v32  ;;  %v2046_v39 = vld [vmem:[%s3119_s1 + $0x18c] sm:$0xf0]  ;;  %v2012_v40 = vld [vmem:[%s3119_s1 + $0x84] sm:$0xf]  ;;  %v1454_v41 = vld [vmem:[%s3119_s1 + $0x90] sm:$0xf0]  ;;  %v1453_v44 = vor.u32 %v2014_v36, %v1452_v35 }
   0xb   :  { %v2044_v42 = vld [vmem:[%s3119_s1 + $0x184] sm:$0xf]  ;;  %v1582_v43 = vld [vmem:[%s3119_s1 + $0x190] sm:$0xf0]  ;;  %v1581_v45 = vor.u32 %v2046_v39, %v1580_v37  ;;  %v1457_v46 = vor.u32 %v2012_v40, %v1454_v41  ;;  %v1436_v47 = vld [vmem:[%s3119_s1 + $0x60] sm:$0xf] }
   0xc   :  { %449 = vmatpush.bf16.msra.mxu0 %v1469_v29  ;;  %v2010_v48 = vld [vmem:[%s3119_s1 + $0x6c] sm:$0xf0]  ;;  %v1564_v49 = vld [vmem:[%s3119_s1 + $0x160] sm:$0xf]  ;;  %v1585_v50 = vor.u32 %v2044_v42, %v1582_v43  ;;  %v2008_v52 = vld [vmem:[%s3119_s1 + $0x64] sm:$0xf] }
   0xd   :  { %463 = vmatpush.bf16.msra.mxu1 %v1597_v33  ;;  %477 = vmatpush.bf16.msra.mxu2 %v1473_v34  ;;  %v2042_v51 = vld [vmem:[%s3119_s1 + $0x16c] sm:$0xf0]  ;;  %v1438_v53 = vld [vmem:[%s3119_s1 + $0x70] sm:$0xf0]  ;;  %v2040_v54 = vld [vmem:[%s3119_s1 + $0x164] sm:$0xf]  ;;  %v1437_v56 = vor.u32 %v2010_v48, %v1436_v47 }
   0xe   :  { %491 = vmatpush.bf16.msra.mxu3 %v1601_v38  ;;  %v1566_v55 = vld [vmem:[%s3119_s1 + $0x170] sm:$0xf0]  ;;  %v1565_v57 = vor.u32 %v2042_v51, %v1564_v49  ;;  %v1441_v58 = vor.u32 %v2008_v52, %v1438_v53  ;;  %v1420_v59 = vld [vmem:[%s3119_s1 + $0x40] sm:$0xf]  ;;  %v2006_v60 = vld [vmem:[%s3119_s1 + $0x4c] sm:$0xf0] }
   0xf   :  { %v1548_v61 = vld [vmem:[%s3119_s1 + $0x140] sm:$0xf]  ;;  %v1569_v62 = vor.u32 %v2040_v54, %v1566_v55  ;;  %v2038_v63 = vld [vmem:[%s3119_s1 + $0x14c] sm:$0xf0]  ;;  %v2004_v0 = vld [vmem:[%s3119_s1 + $0x44] sm:$0xf]  ;;  %v1421_v4 = vor.u32 %v2006_v60, %v1420_v59 }
  0x10   :  { %450 = vmatpush.bf16.msra.mxu0 %v1453_v44  ;;  %v1422_v1 = vld [vmem:[%s3119_s1 + $0x50] sm:$0xf0]  ;;  %v2036_v2 = vld [vmem:[%s3119_s1 + $0x144] sm:$0xf]  ;;  %v1549_v5 = vor.u32 %v2038_v63, %v1548_v61  ;;  %v1404_v7 = vld [vmem:[%s3119_s1 + $0x20] sm:$0xf] }
  0x11   :  { %464 = vmatpush.bf16.msra.mxu1 %v1581_v45  ;;  %478 = vmatpush.bf16.msra.mxu2 %v1457_v46  ;;  %v1550_v3 = vld [vmem:[%s3119_s1 + $0x150] sm:$0xf0]  ;;  %v1425_v6 = vor.u32 %v2004_v0, %v1422_v1  ;;  %v2002_v8 = vld [vmem:[%s3119_s1 + $0x2c] sm:$0xf0]  ;;  %v1532_v9 = vld [vmem:[%s3119_s1 + $0x120] sm:$0xf] }
  0x12   :  { %492 = vmatpush.bf16.msra.mxu3 %v1585_v50  ;;  %v1553_v10 = vor.u32 %v2036_v2, %v1550_v3  ;;  %v2034_v11 = vld [vmem:[%s3119_s1 + $0x12c] sm:$0xf0]  ;;  %v2000_v12 = vld [vmem:[%s3119_s1 + $0x24] sm:$0xf]  ;;  %v1406_v13 = vld [vmem:[%s3119_s1 + $0x30] sm:$0xf0]  ;;  %v1405_v16 = vor.u32 %v2002_v8, %v1404_v7 }
  0x13   :  { %v2032_v14 = vld [vmem:[%s3119_s1 + $0x124] sm:$0xf]  ;;  %v1534_v15 = vld [vmem:[%s3119_s1 + $0x130] sm:$0xf0]  ;;  %v1388_v17 = vld [vmem:[%s3119_s1] sm:$0xf]  ;;  %v1533_v20 = vor.u32 %v2034_v11, %v1532_v9  ;;  %v1409_v21 = vor.u32 %v2000_v12, %v1406_v13 }
  0x14   :  { %451 = vmatpush.bf16.msra.mxu0 %v1437_v56  ;;  %v1998_v18 = vld [vmem:[%s3119_s1 + $0xc] sm:$0xf0]  ;;  %v1516_v19 = vld [vmem:[%s3119_s1 + $0x100] sm:$0xf]  ;;  %v1996_v23 = vld [vmem:[%s3119_s1 + $0x4] sm:$0xf]  ;;  %v1537_v25 = vor.u32 %v2032_v14, %v1534_v15 }
  0x15   :  { %465 = vmatpush.bf16.msra.mxu1 %v1565_v57  ;;  %479 = vmatpush.bf16.msra.mxu2 %v1441_v58  ;;  %v2030_v22 = vld [vmem:[%s3119_s1 + $0x10c] sm:$0xf0]  ;;  %v1390_v24 = vld [vmem:[%s3119_s1 + $0x10] sm:$0xf0]  ;;  %v2028_v26 = vld [vmem:[%s3119_s1 + $0x104] sm:$0xf]  ;;  %v1389_v32 = vor.u32 %v1998_v18, %v1388_v17 }
  0x16   :  { %493 = vmatpush.bf16.msra.mxu3 %v1569_v62  ;;  %v1518_v27 = vld [vmem:[%s3119_s1 + $0x110] sm:$0xf0]  ;;  %v1508_v28 = vld [vmem:[%s3119_s1 + $0xe8] sm:$0xf]  ;;  %v2027_v29 = vld [vmem:[%s3119_s1 + $0xf4] sm:$0xf0]  ;;  %v1517_v36 = vor.u32 %v2030_v22, %v1516_v19  ;;  %v1393_v37 = vor.u32 %v1996_v23, %v1390_v24 }
  0x17   :  { %v1636_v30 = vld [vmem:[%s3119_s1 + $0x1e8] sm:$0xf]  ;;  %v2059_v31 = vld [vmem:[%s3119_s1 + $0x1f4] sm:$0xf0]  ;;  %v2025_v33 = vld [vmem:[%s3119_s1 + $0xec] sm:$0xf]  ;;  %v1521_v41 = vor.u32 %v2028_v26, %v1518_v27  ;;  %v1509_v42 = vor.u32 %v2027_v29, %v1508_v28 }
  0x18   :  { %452 = vmatpush.bf16.msra.mxu0 %v1421_v4  ;;  %v1510_v34 = vld [vmem:[%s3119_s1 + $0xf8] sm:$0xf0]  ;;  %v2057_v35 = vld [vmem:[%s3119_s1 + $0x1ec] sm:$0xf]  ;;  %v1380_v39 = vld [vmem:[%s3120_s0] sm:$0xf]  ;;  %v1637_v45 = vor.u32 %v2059_v31, %v1636_v30 }
  0x19   :  { %466 = vmatpush.bf16.msra.mxu1 %v1549_v5  ;;  %480 = vmatpush.bf16.msra.mxu2 %v1425_v6  ;;  %v1638_v38 = vld [vmem:[%s3119_s1 + $0x1f8] sm:$0xf0]  ;;  %v1995_v40 = vld [vmem:[%s3120_s0 + $0x4] sm:$0xf0]  ;;  %v1994_v43 = vld [vmem:[%s3120_s0 + $0x4] sm:$0xf]  ;;  %v1513_v46 = vor.u32 %v2025_v33, %v1510_v34 }
  0x1a   :  { %494 = vmatpush.bf16.msra.mxu3 %v1553_v10  ;;  %v1382_v44 = vld [vmem:[%s3120_s0 + $0x8] sm:$0xf0]  ;;  %v1492_v47 = vld [vmem:[%s3119_s1 + $0xc8] sm:$0xf]  ;;  %v2023_v48 = vld [vmem:[%s3119_s1 + $0xd4] sm:$0xf0]  ;;  %v1641_v50 = vor.u32 %v2057_v35, %v1638_v38  ;;  %v2453_v51 = vor.u32 %v1995_v40, %v1380_v39 }
  0x1b   :  { %v1620_v49 = vld [vmem:[%s3119_s1 + $0x1c8] sm:$0xf]  ;;  %v2055_v52 = vld [vmem:[%s3119_s1 + $0x1d4] sm:$0xf0]  ;;  %v2021_v53 = vld [vmem:[%s3119_s1 + $0xcc] sm:$0xf]  ;;  %v2464_v55 = vor.u32 %v1994_v43, %v1382_v44  ;;  %v1493_v58 = vor.u32 %v2023_v48, %v1492_v47 }
  0x1c   :  { %453 = vmatpush.bf16.msra.mxu0 %v1405_v16  ;;  %v1494_v54 = vld [vmem:[%s3119_s1 + $0xd8] sm:$0xf0]  ;;  %v2053_v56 = vld [vmem:[%s3119_s1 + $0x1cc] sm:$0xf]  ;;  %v1621_v59 = vor.u32 %v2055_v52, %v1620_v49  ;;  %v1476_v61 = vld [vmem:[%s3119_s1 + $0xa8] sm:$0xf] }
  0x1d   :  { %467 = vmatpush.bf16.msra.mxu1 %v1533_v20  ;;  %481 = vmatpush.bf16.msra.mxu2 %v1409_v21  ;;  %v1622_v57 = vld [vmem:[%s3119_s1 + $0x1d8] sm:$0xf0]  ;;  %v1497_v60 = vor.u32 %v2021_v53, %v1494_v54  ;;  %v2019_v62 = vld [vmem:[%s3119_s1 + $0xb4] sm:$0xf0]  ;;  %v1604_v63 = vld [vmem:[%s3119_s1 + $0x1a8] sm:$0xf] }
  0x1e   :  { %495 = vmatpush.bf16.msra.mxu3 %v1537_v25  ;;  %v1625_v0 = vor.u32 %v2053_v56, %v1622_v57  ;;  %v2051_v1 = vld [vmem:[%s3119_s1 + $0x1b4] sm:$0xf0]  ;;  %v2017_v2 = vld [vmem:[%s3119_s1 + $0xac] sm:$0xf]  ;;  %v1478_v3 = vld [vmem:[%s3119_s1 + $0xb8] sm:$0xf0]  ;;  %v1477_v6 = vor.u32 %v2019_v62, %v1476_v61 }
  0x1f   :  { %v2049_v4 = vld [vmem:[%s3119_s1 + $0x1ac] sm:$0xf]  ;;  %v1606_v5 = vld [vmem:[%s3119_s1 + $0x1b8] sm:$0xf0]  ;;  %v1605_v7 = vor.u32 %v2051_v1, %v1604_v63  ;;  %v1481_v8 = vor.u32 %v2017_v2, %v1478_v3  ;;  %v1460_v9 = vld [vmem:[%s3119_s1 + $0x88] sm:$0xf] }
  0x20   :  { %454 = vmatpush.bf16.msra.mxu0 %v1389_v32  ;;  %v2015_v10 = vld [vmem:[%s3119_s1 + $0x94] sm:$0xf0]  ;;  %v1588_v11 = vld [vmem:[%s3119_s1 + $0x188] sm:$0xf]  ;;  %v1609_v12 = vor.u32 %v2049_v4, %v1606_v5  ;;  %v2013_v14 = vld [vmem:[%s3119_s1 + $0x8c] sm:$0xf] }
  0x21   :  { %468 = vmatpush.bf16.msra.mxu1 %v1517_v36  ;;  %482 = vmatpush.bf16.msra.mxu2 %v1393_v37  ;;  %v2047_v13 = vld [vmem:[%s3119_s1 + $0x194] sm:$0xf0]  ;;  %v1462_v15 = vld [vmem:[%s3119_s1 + $0x98] sm:$0xf0]  ;;  %v2045_v16 = vld [vmem:[%s3119_s1 + $0x18c] sm:$0xf]  ;;  %v1461_v18 = vor.u32 %v2015_v10, %v1460_v9 }
  0x22   :  { %496 = vmatpush.bf16.msra.mxu3 %v1521_v41  ;;  %v1590_v17 = vld [vmem:[%s3119_s1 + $0x198] sm:$0xf0]  ;;  %v1589_v19 = vor.u32 %v2047_v13, %v1588_v11  ;;  %v1465_v20 = vor.u32 %v2013_v14, %v1462_v15  ;;  %v1444_v21 = vld [vmem:[%s3119_s1 + $0x68] sm:$0xf]  ;;  %v2011_v22 = vld [vmem:[%s3119_s1 + $0x74] sm:$0xf0] }
  0x23   :  { %455 = vmatmul.bf16.vlgmr.msra.gmra.mxu0 %v2453_v51  ;;  %v1572_v23 = vld [vmem:[%s3119_s1 + $0x168] sm:$0xf]  ;;  %v1593_v24 = vor.u32 %v2045_v16, %v1590_v17  ;;  %v2043_v25 = vld [vmem:[%s3119_s1 + $0x174] sm:$0xf0]  ;;  %v2009_v26 = vld [vmem:[%s3119_s1 + $0x6c] sm:$0xf]  ;;  %v1445_v30 = vor.u32 %v2011_v22, %v1444_v21 }
  0x24   :  { %503 = vmatpush.bf16.msrb.mxu0 %v1509_v42  ;;  %483 = vmatmul.bf16.vlgmr.msra.gmra.mxu2 %v2453_v51  ;;  %v1446_v27 = vld [vmem:[%s3119_s1 + $0x78] sm:$0xf0]  ;;  %v2041_v28 = vld [vmem:[%s3119_s1 + $0x16c] sm:$0xf]  ;;  %v1573_v31 = vor.u32 %v2043_v25, %v1572_v23  ;;  %v1428_v33 = vld [vmem:[%s3119_s1 + $0x48] sm:$0xf] }
  0x25   :  { %517 = vmatpush.bf16.msrb.mxu1 %v1637_v45  ;;  %531 = vmatpush.bf16.msrb.mxu2 %v1513_v46  ;;  %v1574_v29 = vld [vmem:[%s3119_s1 + $0x178] sm:$0xf0]  ;;  %v1449_v32 = vor.u32 %v2009_v26, %v1446_v27  ;;  %v2007_v34 = vld [vmem:[%s3119_s1 + $0x54] sm:$0xf0]  ;;  %v1556_v35 = vld [vmem:[%s3119_s1 + $0x148] sm:$0xf] }
  0x26   :  { %545 = vmatpush.bf16.msrb.mxu3 %v1641_v50  ;;  %469 = vmatmul.bf16.vlgmr.msra.gmra.mxu1 %v2464_v55  ;;  %v1577_v36 = vor.u32 %v2041_v28, %v1574_v29  ;;  %v2039_v37 = vld [vmem:[%s3119_s1 + $0x154] sm:$0xf0]  ;;  %v2005_v38 = vld [vmem:[%s3119_s1 + $0x4c] sm:$0xf]  ;;  %v1430_v39 = vld [vmem:[%s3119_s1 + $0x58] sm:$0xf0]  ;;  %v1429_v42 = vor.u32 %v2007_v34, %v1428_v33 }
  0x27   :  { %497 = vmatmul.bf16.vlgmr.msra.gmra.mxu3 %v2464_v55  ;;  %v2037_v40 = vld [vmem:[%s3119_s1 + $0x14c] sm:$0xf]  ;;  %v1558_v41 = vld [vmem:[%s3119_s1 + $0x158] sm:$0xf0]  ;;  %v1557_v43 = vor.u32 %v2039_v37, %v1556_v35  ;;  %v1433_v44 = vor.u32 %v2005_v38, %v1430_v39  ;;  %v1412_v45 = vld [vmem:[%s3119_s1 + $0x28] sm:$0xf] }
  0x28   :  { %504 = vmatpush.bf16.msrb.mxu0 %v1493_v58  ;;  %v2003_v46 = vld [vmem:[%s3119_s1 + $0x34] sm:$0xf0]  ;;  %v1540_v47 = vld [vmem:[%s3119_s1 + $0x128] sm:$0xf]  ;;  %v1561_v48 = vor.u32 %v2037_v40, %v1558_v41  ;;  %v2001_v50 = vld [vmem:[%s3119_s1 + $0x2c] sm:$0xf] }
  0x29   :  { %518 = vmatpush.bf16.msrb.mxu1 %v1621_v59  ;;  %532 = vmatpush.bf16.msrb.mxu2 %v1497_v60  ;;  %v2035_v49 = vld [vmem:[%s3119_s1 + $0x134] sm:$0xf0]  ;;  %v1414_v52 = vld [vmem:[%s3119_s1 + $0x38] sm:$0xf0]  ;;  %v2033_v53 = vld [vmem:[%s3119_s1 + $0x12c] sm:$0xf]  ;;  %v1413_v56 = vor.u32 %v2003_v46, %v1412_v45 }
  0x2a   :  { %546 = vmatpush.bf16.msrb.mxu3 %v1625_v0  ;;  %v1542_v54 = vld [vmem:[%s3119_s1 + $0x138] sm:$0xf0]  ;;  %v1396_v57 = vld [vmem:[%s3119_s1 + $0x8] sm:$0xf]  ;;  %v1541_v58 = vor.u32 %v2035_v49, %v1540_v47  ;;  %v1417_v59 = vor.u32 %v2001_v50, %v1414_v52  ;;  %v1999_v60 = vld [vmem:[%s3119_s1 + $0x14] sm:$0xf0] }
  0x2b   :  { %v1524_v61 = vld [vmem:[%s3119_s1 + $0x108] sm:$0xf]  ;;  %v2031_v62 = vld [vmem:[%s3119_s1 + $0x114] sm:$0xf0]  ;;  %v1545_v63 = vor.u32 %v2033_v53, %v1542_v54  ;;  %v1997_v0 = vld [vmem:[%s3119_s1 + $0xc] sm:$0xf] }
  0x2c   :  { %505 = vmatpush.bf16.msrb.mxu0 %v1477_v6  ;;  %v1398_v1 = vld [vmem:[%s3119_s1 + $0x18] sm:$0xf0]  ;;  %v2029_v2 = vld [vmem:[%s3119_s1 + $0x10c] sm:$0xf]  ;;  %v1700_v4 = vld [vmem:[%s3121_s4 + $0x70] sm:$0xf]  ;;  %v1397_v6 = vor.u32 %v1999_v60, %v1396_v57  ;;  %v1525_v9 = vor.u32 %v2031_v62, %v1524_v61 }
  0x2d   :  { %519 = vmatpush.bf16.msrb.mxu1 %v1605_v7  ;;  %533 = vmatpush.bf16.msrb.mxu2 %v1481_v8  ;;  %v1526_v3 = vld [vmem:[%s3119_s1 + $0x118] sm:$0xf0]  ;;  %v2075_v5 = vld [vmem:[%s3121_s4 + $0x74] sm:$0xf0]  ;;  %v1764_v7 = vld [vmem:[%s3121_s4 + $0xf0] sm:$0xf]  ;;  %v1401_v10 = vor.u32 %v1997_v0, %v1398_v1 }
  0x2e   :  { %547 = vmatpush.bf16.msrb.mxu3 %v1609_v12  ;;  %v2091_v8 = vld [vmem:[%s3121_s4 + $0xf4] sm:$0xf0]  ;;  %v1529_v11 = vor.u32 %v2029_v2, %v1526_v3  ;;  %v1701_v12 = vor.u32 %v2075_v5, %v1700_v4  ;;  %v1692_v13 = vld [vmem:[%s3121_s4 + $0x60] sm:$0xf]  ;;  %v2073_v14 = vld [vmem:[%s3121_s4 + $0x64] sm:$0xf0] }
  0x2f   :  { %v1765_v15 = vor.u32 %v2091_v8, %v1764_v7  ;;  %v1756_v16 = vld [vmem:[%s3121_s4 + $0xe0] sm:$0xf]  ;;  %v2089_v17 = vld [vmem:[%s3121_s4 + $0xe4] sm:$0xf0]  ;;  %v1748_v22 = vld [vmem:[%s3121_s4 + $0xd0] sm:$0xf] }
  0x30   :  { %506 = vmatpush.bf16.msrb.mxu0 %v1461_v18  ;;  %v1693_v18 = vor.u32 %v2073_v14, %v1692_v13  ;;  %v1757_v21 = vor.u32 %v2089_v17, %v1756_v16  ;;  %v2087_v23 = vld [vmem:[%s3121_s4 + $0xd4] sm:$0xf0]  ;;  %v1676_v25 = vld [vmem:[%s3121_s4 + $0x40] sm:$0xf]  ;;  %v1668_v29 = vld [vmem:[%s3121_s4 + $0x30] sm:$0xf] }
  0x31   :  { %520 = vmatpush.bf16.msrb.mxu1 %v1589_v19  ;;  %534 = vmatpush.bf16.msrb.mxu2 %v1465_v20  ;;  %v1684_v19 = vld [vmem:[%s3121_s4 + $0x50] sm:$0xf]  ;;  %v2071_v20 = vld [vmem:[%s3121_s4 + $0x54] sm:$0xf0]  ;;  %v1749_v26 = vor.u32 %v2087_v23, %v1748_v22  ;;  %v1740_v27 = vld [vmem:[%s3121_s4 + $0xc0] sm:$0xf] }
  0x32   :  { %548 = vmatpush.bf16.msrb.mxu3 %v1593_v24  ;;  %v1685_v24 = vor.u32 %v2071_v20, %v1684_v19  ;;  %v2083_v33 = vld [vmem:[%s3121_s4 + $0xb4] sm:$0xf0]  ;;  %v1660_v35 = vld [vmem:[%s3121_s4 + $0x20] sm:$0xf]  ;;  %v1652_v39 = vld [vmem:[%s3121_s4 + $0x10] sm:$0xf] }
  0x33   :  { %v2063_v40 = vld [vmem:[%s3121_s4 + $0x14] sm:$0xf0]  ;;  %v1644_v45 = vld [vmem:[%s3121_s4] sm:$0xf]  ;;  %v2061_v46 = vld [vmem:[%s3121_s4 + $0x4] sm:$0xf0] }
  0x34   :  { %507 = vmatpush.bf16.msrb.mxu0 %v1445_v30  ;;  %v2067_v30 = vld [vmem:[%s3121_s4 + $0x34] sm:$0xf0]  ;;  %v1653_v41 = vor.u32 %v2063_v40, %v1652_v39  ;;  %v1645_v47 = vor.u32 %v2061_v46, %v1644_v45  ;;  %v2074_v50 = vld [vmem:[%s3121_s4 + $0x74] sm:$0xf]  ;;  %v1702_v53 = vld [vmem:[%s3121_s4 + $0x78] sm:$0xf0] }
  0x35   :  { %521 = vmatpush.bf16.msrb.mxu1 %v1573_v31  ;;  %535 = vmatpush.bf16.msrb.mxu2 %v1449_v32  ;;  %v1732_v32 = vld [vmem:[%s3121_s4 + $0xb0] sm:$0xf]  ;;  %v1669_v34 = vor.u32 %v2067_v30, %v1668_v29  ;;  %v2107_v49 = vld [vmem:[%s3121_s4 + $0x174] sm:$0xf0]  ;;  %v2105_v60 = vld [vmem:[%s3121_s4 + $0x164] sm:$0xf0] }
  0x36   :  { %549 = vmatpush.bf16.msrb.mxu3 %v1577_v36  ;;  %v2065_v36 = vld [vmem:[%s3121_s4 + $0x24] sm:$0xf0]  ;;  %v1733_v37 = vor.u32 %v2083_v33, %v1732_v32  ;;  %v1716_v54 = vld [vmem:[%s3121_s4 + $0x90] sm:$0xf]  ;;  %v2079_v57 = vld [vmem:[%s3121_s4 + $0x94] sm:$0xf0] }
  0x37   :  { %v1661_v38 = vor.u32 %v2065_v36, %v1660_v35  ;;  %v2072_v61 = vld [vmem:[%s3121_s4 + $0x64] sm:$0xf]  ;;  %v1708_v0 = vld [vmem:[%s3121_s4 + $0x80] sm:$0xf]  ;;  %v2077_v2 = vld [vmem:[%s3121_s4 + $0x84] sm:$0xf0] }
  0x38   :  { %508 = vmatpush.bf16.msrb.mxu0 %v1429_v42  ;;  %v1724_v42 = vld [vmem:[%s3121_s4 + $0xa0] sm:$0xf]  ;;  %v1892_v3 = vld [vmem:[%s3121_s4 + $0x1f0] sm:$0xf]  ;;  %v2123_v4 = vld [vmem:[%s3121_s4 + $0x1f4] sm:$0xf0]  ;;  %v1709_v5 = vor.u32 %v2077_v2, %v1708_v0 }
  0x39   :  { %522 = vmatpush.bf16.msrb.mxu1 %v1557_v43  ;;  %536 = vmatpush.bf16.msrb.mxu2 %v1433_v44  ;;  %v2081_v43 = vld [vmem:[%s3121_s4 + $0xa4] sm:$0xf0]  ;;  %v2090_v7 = vld [vmem:[%s3121_s4 + $0xf4] sm:$0xf]  ;;  %v1766_v8 = vld [vmem:[%s3121_s4 + $0xf8] sm:$0xf0] }
  0x3a   :  { %550 = vmatpush.bf16.msrb.mxu3 %v1561_v48  ;;  %v1725_v44 = vor.u32 %v2081_v43, %v1724_v42  ;;  %v1828_v48 = vld [vmem:[%s3121_s4 + $0x170] sm:$0xf]  ;;  %v1686_v14 = vld [vmem:[%s3121_s4 + $0x58] sm:$0xf0]  ;;  %v1884_v16 = vld [vmem:[%s3121_s4 + $0x1e0] sm:$0xf] }
  0x3b   :  { %v1829_v52 = vor.u32 %v2107_v49, %v1828_v48  ;;  %v2121_v17 = vld [vmem:[%s3121_s4 + $0x1e4] sm:$0xf0]  ;;  %v2088_v19 = vld [vmem:[%s3121_s4 + $0xe4] sm:$0xf]  ;;  %v1758_v20 = vld [vmem:[%s3121_s4 + $0xe8] sm:$0xf0] }
  0x3c   :  { %509 = vmatpush.bf16.msrb.mxu0 %v1413_v56  ;;  %v1705_v56 = vor.u32 %v2074_v50, %v1702_v53  ;;  %v1804_v22 = vld [vmem:[%s3121_s4 + $0x140] sm:$0xf]  ;;  %v2101_v23 = vld [vmem:[%s3121_s4 + $0x144] sm:$0xf0]  ;;  %v1750_v30 = vld [vmem:[%s3121_s4 + $0xd8] sm:$0xf0] }
  0x3d   :  { %523 = vmatpush.bf16.msrb.mxu1 %v1541_v58  ;;  %537 = vmatpush.bf16.msrb.mxu2 %v1417_v59  ;;  %v1717_v58 = vor.u32 %v2079_v57, %v1716_v54  ;;  %v1820_v59 = vld [vmem:[%s3121_s4 + $0x160] sm:$0xf]  ;;  %v1796_v32 = vld [vmem:[%s3121_s4 + $0x130] sm:$0xf]  ;;  %v2099_v33 = vld [vmem:[%s3121_s4 + $0x134] sm:$0xf0] }
  0x3e   :  { %551 = vmatpush.bf16.msrb.mxu3 %v1545_v63  ;;  %v1821_v62 = vor.u32 %v2105_v60, %v1820_v59  ;;  %v1694_v63 = vld [vmem:[%s3121_s4 + $0x68] sm:$0xf0]  ;;  %v1797_v35 = vor.u32 %v2099_v33, %v1796_v32  ;;  %v1670_v36 = vld [vmem:[%s3121_s4 + $0x38] sm:$0xf0]  ;;  %v2117_v39 = vld [vmem:[%s3121_s4 + $0x1c4] sm:$0xf0] }
  0x3f   :  { %v1697_v1 = vor.u32 %v2072_v61, %v1694_v63  ;;  %v2084_v40 = vld [vmem:[%s3121_s4 + $0xc4] sm:$0xf]  ;;  %v1742_v42 = vld [vmem:[%s3121_s4 + $0xc8] sm:$0xf0]  ;;  %v2097_v45 = vld [vmem:[%s3121_s4 + $0x124] sm:$0xf0] }
  0x40   :  { %510 = vmatpush.bf16.msrb.mxu0 %v1397_v6  ;;  %v1893_v6 = vor.u32 %v2123_v4, %v1892_v3  ;;  %v1745_v43 = vor.u32 %v2084_v40, %v1742_v42  ;;  %v2064_v46 = vld [vmem:[%s3121_s4 + $0x24] sm:$0xf]  ;;  %v1662_v48 = vld [vmem:[%s3121_s4 + $0x28] sm:$0xf0]  ;;  %v1860_v50 = vld [vmem:[%s3121_s4 + $0x1b0] sm:$0xf] }
  0x41   :  { %524 = vmatpush.bf16.msrb.mxu1 %v1525_v9  ;;  %538 = vmatpush.bf16.msrb.mxu2 %v1401_v10  ;;  %v1769_v9 = vor.u32 %v2090_v7, %v1766_v8  ;;  %v1812_v10 = vld [vmem:[%s3121_s4 + $0x150] sm:$0xf]  ;;  %v1665_v49 = vor.u32 %v2064_v46, %v1662_v48  ;;  %v2082_v53 = vld [vmem:[%s3121_s4 + $0xb4] sm:$0xf]  ;;  %v2861_v59 = vld [vmem:[%s3122_s2] sm:$0xf] }
  0x42   :  { %552 = vmatpush.bf16.msrb.mxu3 %v1529_v11  ;;  %v2103_v11 = vld [vmem:[%s3121_s4 + $0x154] sm:$0xf0]  ;;  %v1780_v57 = vld [vmem:[%s3121_s4 + $0x110] sm:$0xf]  ;;  %v1654_v63 = vld [vmem:[%s3121_s4 + $0x18] sm:$0xf0] }
  0x43   :  { %511 = vmatmul.bf16.vlgmr.msrb.gmra.mxu0 %v2453_v51  ;;  %v1813_v13 = vor.u32 %v2103_v11, %v1812_v10  ;;  %v2113_v2 = vld [vmem:[%s3121_s4 + $0x1a4] sm:$0xf0]  ;;  %v2080_v3 = vld [vmem:[%s3121_s4 + $0xa4] sm:$0xf]  ;;  %v109_v4 = vperm.slane %v2861_v59, 0 }
  0x44   :  { %987 = vmatpush.bf16.msra.mxu0 %v1701_v12  ;;  %525 = vmatmul.bf16.vlgmr.msrb.gmra.mxu1 %v2464_v55  ;;  %v2070_v12 = vld [vmem:[%s3121_s4 + $0x54] sm:$0xf]  ;;  %v1772_v8 = vld [vmem:[%s3121_s4 + $0x100] sm:$0xf]  ;;  %v2060_v10 = vld [vmem:[%s3121_s4 + $0x4] sm:$0xf] }
  0x45   :  { %1001 = vmatpush.bf16.msra.mxu1 %v1765_v15  ;;  %539 = vmatmul.bf16.vlgmr.msrb.gmra.mxu2 %v2453_v51  ;;  %v2069_v51 = vld [vmem:[%s3121_s4 + $0x44] sm:$0xf0]  ;;  %v1689_v15 = vor.u32 %v2070_v12, %v1686_v14  ;;  %v1646_v12 = vld [vmem:[%s3121_s4 + $0x8] sm:$0xf0]  ;;  %v1830_v14 = vld [vmem:[%s3121_s4 + $0x178] sm:$0xf0] }
  0x46   :  { %553 = vmatmul.bf16.vlgmr.msrb.gmra.mxu3 %v2464_v55  ;;  %v2085_v55 = vld [vmem:[%s3121_s4 + $0xc4] sm:$0xf0]  ;;  %v1677_v28 = vor.u32 %v2069_v51, %v1676_v25  ;;  %1015 = vmatpush.bf16.msra.mxu2 %v1829_v52  ;;  %v1805_v25 = vor.u32 %v2101_v23, %v1804_v22  ;;  %v1678_v51 = vld [vmem:[%s3121_s4 + $0x48] sm:$0xf0]  ;;  %v2115_v52 = vld [vmem:[%s3121_s4 + $0x1b4] sm:$0xf0] }
  0x47   :  { %v1741_v31 = vor.u32 %v2085_v55, %v1740_v27  ;;  %1029 = vmatpush.bf16.msra.mxu3 %v1893_v6  ;;  %v1876_v27 = vld [vmem:[%s3121_s4 + $0x1d0] sm:$0xf]  ;;  %v2119_v55 = vld [vmem:[%s3121_s4 + $0x1d4] sm:$0xf0]  ;;  %v1861_v54 = vor.u32 %v2115_v52, %v1860_v50  ;;  %v1726_v6 = vld [vmem:[%s3121_s4 + $0xa8] sm:$0xf0] }
  0x48   :  { %988 = vmatpush.bf16.msra.mxu0 %v1693_v18  ;;  %v1885_v18 = vor.u32 %v2121_v17, %v1884_v16  ;;  %v1877_v29 = vor.u32 %v2119_v55, %v1876_v27  ;;  %v1729_v7 = vor.u32 %v2080_v3, %v1726_v6  ;;  %v1649_v16 = vor.u32 %v2060_v10, %v1646_v12  ;;  %v1822_v27 = vld [vmem:[%s3121_s4 + $0x168] sm:$0xf0]  ;;  %v1814_v42 = vld [vmem:[%s3121_s4 + $0x158] sm:$0xf0]  ;;  %v2120_v50 = vld [vmem:[%s3121_s4 + $0x1e4] sm:$0xf] }
  0x49   :  { %1002 = vmatpush.bf16.msra.mxu1 %v1757_v21  ;;  %v1761_v21 = vor.u32 %v2088_v19, %v1758_v20  ;;  %v2111_v19 = vld [vmem:[%s3121_s4 + $0x194] sm:$0xf0]  ;;  %v2078_v20 = vld [vmem:[%s3121_s4 + $0x94] sm:$0xf]  ;;  %v110_v55 = vperm.slane %v2861_v59, 1 }
  0x4a   :  { %1016 = vmatpush.bf16.msra.mxu2 %v1821_v62  ;;  %v2062_v62 = vld [vmem:[%s3121_s4 + $0x14] sm:$0xf]  ;;  %v1886_v52 = vld [vmem:[%s3121_s4 + $0x1e8] sm:$0xf0]  ;;  %v1798_v6 = vld [vmem:[%s3121_s4 + $0x138] sm:$0xf0] }
  0x4b   :  { %1030 = vmatpush.bf16.msra.mxu3 %v1885_v18  ;;  %v1657_v0 = vor.u32 %v2062_v62, %v1654_v63  ;;  %v1844_v18 = vld [vmem:[%s3121_s4 + $0x190] sm:$0xf]  ;;  %v2116_v12 = vld [vmem:[%s3121_s4 + $0x1c4] sm:$0xf] }
  0x4c   :  { %989 = vmatpush.bf16.msra.mxu0 %v1685_v24  ;;  %v2068_v24 = vld [vmem:[%s3121_s4 + $0x44] sm:$0xf]  ;;  %v1845_v23 = vor.u32 %v2111_v19, %v1844_v18 }
  0x4d   :  { %1003 = vmatpush.bf16.msra.mxu1 %v1749_v26  ;;  %v1681_v26 = vor.u32 %v2068_v24, %v1678_v51  ;;  %v1718_v24 = vld [vmem:[%s3121_s4 + $0x98] sm:$0xf0] }
  0x4e   :  { %1017 = vmatpush.bf16.msra.mxu2 %v1813_v13  ;;  %v2106_v13 = vld [vmem:[%s3121_s4 + $0x174] sm:$0xf]  ;;  %v1721_v51 = vor.u32 %v2078_v20, %v1718_v24 }
  0x4f   :  { %1031 = vmatpush.bf16.msra.mxu3 %v1877_v29  ;;  %v1833_v17 = vor.u32 %v2106_v13, %v1830_v14  ;;  %v1836_v29 = vld [vmem:[%s3121_s4 + $0x180] sm:$0xf]  ;;  %v1870_v13 = vld [vmem:[%s3121_s4 + $0x1c8] sm:$0xf0] }
  0x50   :  { %990 = vmatpush.bf16.msra.mxu0 %v1677_v28  ;;  %v2086_v28 = vld [vmem:[%s3121_s4 + $0xd4] sm:$0xf] }
  0x51   :  { %1004 = vmatpush.bf16.msra.mxu1 %v1741_v31  ;;  %v1753_v31 = vor.u32 %v2086_v28, %v1750_v30  ;;  %v2109_v30 = vld [vmem:[%s3121_s4 + $0x184] sm:$0xf0] }
  0x52   :  { %1018 = vmatpush.bf16.msra.mxu2 %v1805_v25  ;;  %v2915_v25 = vld [vmem:[%s3123_s3] sm:$0xf]  ;;  %v1837_v33 = vor.u32 %v2109_v30, %v1836_v29  ;;  %v1854_v29 = vld [vmem:[%s3121_s4 + $0x1a8] sm:$0xf0]  ;;  %v2092_v30 = vld [vmem:[%s3121_s4 + $0x104] sm:$0xf] }
  0x53   :  { %v569_v32 = vperm.slane %v2915_v25, 0 }
  0x54   :  { %991 = vmatpush.bf16.msra.mxu0 %v1669_v34  ;;  %v2066_v34 = vld [vmem:[%s3121_s4 + $0x34] sm:$0xf] }
  0x55   :  { %1005 = vmatpush.bf16.msra.mxu1 %v1733_v37  ;;  %v1673_v37 = vor.u32 %v2066_v34, %v1670_v36  ;;  %v2076_v34 = vld [vmem:[%s3121_s4 + $0x84] sm:$0xf] }
  0x56   :  { %1019 = vmatpush.bf16.msra.mxu2 %v1797_v35  ;;  %v1710_v35 = vld [vmem:[%s3121_s4 + $0x88] sm:$0xf0] }
  0x57   :  { %v1713_v36 = vor.u32 %v2076_v34, %v1710_v35  ;;  %v2110_v34 = vld [vmem:[%s3121_s4 + $0x194] sm:$0xf]  ;;  %v1846_v35 = vld [vmem:[%s3121_s4 + $0x198] sm:$0xf0] }
  0x58   :  { %992 = vmatpush.bf16.msra.mxu0 %v1661_v38  ;;  %v1868_v38 = vld [vmem:[%s3121_s4 + $0x1c0] sm:$0xf] }
  0x59   :  { %1006 = vmatpush.bf16.msra.mxu1 %v1725_v44  ;;  %v1788_v44 = vld [vmem:[%s3121_s4 + $0x120] sm:$0xf] }
  0x5c   :  { %993 = vmatpush.bf16.msra.mxu0 %v1653_v41  ;;  %v1869_v41 = vor.u32 %v2117_v39, %v1868_v38  ;;  %v1894_v38 = vld [vmem:[%s3121_s4 + $0x1f8] sm:$0xf0] }
  0x5d   :  { %1007 = vmatpush.bf16.msra.mxu1 %v1717_v58  ;;  %v2095_v58 = vld [vmem:[%s3121_s4 + $0x114] sm:$0xf0] }
  0x5e   :  { %1032 = vmatpush.bf16.msra.mxu3 %v1869_v41  ;;  %v1781_v61 = vor.u32 %v2095_v58, %v1780_v57  ;;  %v2102_v41 = vld [vmem:[%s3121_s4 + $0x154] sm:$0xf]  ;;  %v1806_v57 = vld [vmem:[%s3121_s4 + $0x148] sm:$0xf0] }
  0x5f   :  { %v1817_v46 = vor.u32 %v2102_v41, %v1814_v42  ;;  %v1838_v41 = vld [vmem:[%s3121_s4 + $0x188] sm:$0xf0] }
  0x60   :  { %994 = vmatpush.bf16.msra.mxu0 %v1645_v47  ;;  %v1789_v47 = vor.u32 %v2097_v45, %v1788_v44 }
  0x61   :  { %1008 = vmatpush.bf16.msra.mxu1 %v1709_v5 }
  0x62   :  { %1020 = vmatpush.bf16.msra.mxu2 %v1789_v47  ;;  %1033 = vmatpush.bf16.msra.mxu3 %v1861_v54 }
  0x64   :  { %1043 = vmatpush.bf16.msrb.mxu0 %v1705_v56  ;;  %v1734_v56 = vld [vmem:[%s3121_s4 + $0xb8] sm:$0xf0] }
  0x65   :  { %1057 = vmatpush.bf16.msrb.mxu1 %v1769_v9  ;;  %v1737_v60 = vor.u32 %v2082_v53, %v1734_v56  ;;  %v2093_v9 = vld [vmem:[%s3121_s4 + $0x104] sm:$0xf0]  ;;  %v1889_v53 = vor.u32 %v2120_v50, %v1886_v52  ;;  %v2100_v56 = vld [vmem:[%s3121_s4 + $0x144] sm:$0xf] }
  0x66   :  { %1021 = vmatpush.bf16.msra.mxu2 %v1781_v61  ;;  %v1773_v11 = vor.u32 %v2093_v9, %v1772_v8  ;;  %v1809_v61 = vor.u32 %v2100_v56, %v1806_v57 }
  0x68   :  { %1044 = vmatpush.bf16.msrb.mxu0 %v1697_v1  ;;  %v1852_v1 = vld [vmem:[%s3121_s4 + $0x1a0] sm:$0xf] }
  0x69   :  { %1058 = vmatpush.bf16.msrb.mxu1 %v1761_v21  ;;  %v1853_v5 = vor.u32 %v2113_v2, %v1852_v1  ;;  %v1878_v1 = vld [vmem:[%s3121_s4 + $0x1d8] sm:$0xf0] }
  0x6a   :  { %1022 = vmatpush.bf16.msra.mxu2 %v1773_v11 }
  0x6b   :  { %1034 = vmatpush.bf16.msra.mxu3 %v1853_v5  ;;  %v2098_v5 = vld [vmem:[%s3121_s4 + $0x134] sm:$0xf] }
  0x6c   :  { %1045 = vmatpush.bf16.msrb.mxu0 %v1689_v15  ;;  %v1801_v11 = vor.u32 %v2098_v5, %v1798_v6 }
  0x6d   :  { %1059 = vmatpush.bf16.msrb.mxu1 %v1753_v31 }
  0x6e   :  { %1071 = vmatpush.bf16.msrb.mxu2 %v1833_v17  ;;  %v1790_v17 = vld [vmem:[%s3121_s4 + $0x128] sm:$0xf0] }
  0x6f   :  { %1035 = vmatpush.bf16.msra.mxu3 %v1845_v23 }
  0x70   :  { %1046 = vmatpush.bf16.msrb.mxu0 %v1681_v26  ;;  %v2104_v26 = vld [vmem:[%s3121_s4 + $0x164] sm:$0xf] }
  0x71   :  { %1060 = vmatpush.bf16.msrb.mxu1 %v1745_v43  ;;  %v1825_v28 = vor.u32 %v2104_v26, %v1822_v27  ;;  %v1782_v26 = vld [vmem:[%s3121_s4 + $0x118] sm:$0xf0]  ;;  %v2112_v27 = vld [vmem:[%s3121_s4 + $0x1a4] sm:$0xf] }
  0x73   :  { %1072 = vmatpush.bf16.msrb.mxu2 %v1825_v28  ;;  %1036 = vmatpush.bf16.msra.mxu3 %v1837_v33 }
  0x74   :  { %1047 = vmatpush.bf16.msrb.mxu0 %v1673_v37  ;;  %v2122_v37 = vld [vmem:[%s3121_s4 + $0x1f4] sm:$0xf] }
  0x75   :  { %1061 = vmatpush.bf16.msrb.mxu1 %v1737_v60  ;;  %v1897_v40 = vor.u32 %v2122_v37, %v1894_v38  ;;  %v570_v60 = vperm.slane %v2915_v25, 1  ;;  %v1849_v38 = vor.u32 %v2110_v34, %v1846_v35 }
  0x77   :  { %1085 = vmatpush.bf16.msrb.mxu3 %v1897_v40  ;;  %1073 = vmatpush.bf16.msrb.mxu2 %v1817_v46  ;;  %v2108_v40 = vld [vmem:[%s3121_s4 + $0x184] sm:$0xf]  ;;  %v571_v46 = vperm.slane %v2915_v25, 2 }
  0x78   :  { %1048 = vmatpush.bf16.msrb.mxu0 %v1665_v49 }
  0x79   :  { %1062 = vmatpush.bf16.msrb.mxu1 %v1729_v7 }
  0x7b   :  { %1086 = vmatpush.bf16.msrb.mxu3 %v1889_v53  ;;  %1074 = vmatpush.bf16.msrb.mxu2 %v1809_v61 }
  0x7c   :  { %1049 = vmatpush.bf16.msrb.mxu0 %v1657_v0  ;;  %v2118_v0 = vld [vmem:[%s3121_s4 + $0x1d4] sm:$0xf] }
  0x7d   :  { %1063 = vmatpush.bf16.msrb.mxu1 %v1721_v51  ;;  %v1881_v2 = vor.u32 %v2118_v0, %v1878_v1  ;;  %v2094_v51 = vld [vmem:[%s3121_s4 + $0x114] sm:$0xf] }
  0x7e   :  { %v1785_v28 = vor.u32 %v2094_v51, %v1782_v26 }
  0x7f   :  { %1087 = vmatpush.bf16.msrb.mxu3 %v1881_v2  ;;  %1075 = vmatpush.bf16.msrb.mxu2 %v1801_v11  ;;  %v2127_v11 = vld [vmem:[%s3125_s7 + $0x18] sm:$0xff] }
  0x80   :  { %1050 = vmatpush.bf16.msrb.mxu0 %v1649_v16  ;;  %v2096_v16 = vld [vmem:[%s3121_s4 + $0x124] sm:$0xf] }
  0x81   :  { %1064 = vmatpush.bf16.msrb.mxu1 %v1713_v36  ;;  %v1793_v20 = vor.u32 %v2096_v16, %v1790_v17  ;;  %v111_v36 = vperm.slane %v2861_v59, 2  ;;  %v2137_v16 = vld [vmem:[%s3125_s7 + $0x68] sm:$0xff]  ;;  %v2124_v17 = vld [vmem:[%s3125_s7] sm:$0xff] }
  0x83   :  { %1076 = vmatpush.bf16.msrb.mxu2 %v1793_v20 }
  0x87   :  { %1077 = vmatpush.bf16.msrb.mxu2 %v1785_v28 }
  0xa0   :  { %v456_v15 = vpop.f32.mrf.mxu0 }
  0xa1   :  { %v457_v21 = vadd.f32 %v456_v15, %v109_v4  ;;  %v1873_v15 = vor.u32 %v2116_v12, %v1870_v13  ;;  %v2139_v12 = vld [vmem:[%s3125_s7 + $0x78] sm:$0xff]  ;;  %v2126_v13 = vld [vmem:[%s3125_s7 + $0x10] sm:$0xff] }
  0xa3   :  { %v470_v22 = vpop.f32.mrf.mxu1  ;;  %1088 = vmatpush.bf16.msrb.mxu3 %v1873_v15  ;;  %v2125_v15 = vld [vmem:[%s3125_s7 + $0x8] sm:$0xff] }
  0xa4   :  { %v471_v31 = vadd.f32 %v470_v22, %v457_v21  ;;  %v2114_v21 = vld [vmem:[%s3121_s4 + $0x1b4] sm:$0xf]  ;;  %v1862_v22 = vld [vmem:[%s3121_s4 + $0x1b8] sm:$0xf0] }
  0xa5   :  { %v1865_v24 = vor.u32 %v2114_v21, %v1862_v22  ;;  %v2134_v22 = vld [vmem:[%s3125_s7 + $0x50] sm:$0xff] }
  0xa6   :  { %v577_v47 = vmul.f32 %v569_v32, %v471_v31  ;;  %vm560_vm0 = vcmp.ge.f32.partialorder %v471_v31, 0.0 }
  0xa7   :  { %v484_v39 = vpop.f32.mrf.mxu2  ;;  %1089 = vmatpush.bf16.msrb.mxu3 %v1865_v24  ;;  %v2133_v24 = vld [vmem:[%s3125_s7 + $0x48] sm:$0xff] }
  0xa8   :  { %v485_v43 = vadd.f32 %v484_v39, %v110_v55  ;;  %v458_v44 = vpop.f32.mrf.mxu0  ;;  %v585_v62 = vsel %vm560_vm0, %v471_v31, %v577_v47  ;;  %v1774_v31 = vld [vmem:[%s3121_s4 + $0x108] sm:$0xf0] }
  0xa9   :  { %v459_v48 = vadd.f32 %v458_v44, %v109_v4  ;;  %v1777_v33 = vor.u32 %v2092_v30, %v1774_v31  ;;  %v112_v44 = vperm.slane %v2861_v59, 3 }
  0xaa   :  { %v498_v45 = vpop.f32.mrf.mxu3 }
  0xab   :  { %v472_v49 = vpop.f32.mrf.mxu1  ;;  %v499_v58 = vadd.f32 %v498_v45, %v485_v43  ;;  %1078 = vmatpush.bf16.msrb.mxu2 %v1777_v33  ;;  %v1841_v43 = vor.u32 %v2108_v40, %v1838_v41  ;;  %v1099_v33 = vld [vmem:[%s3127_s6] sm:$0x3] }
  0xac   :  { %v473_v54 = vadd.f32 %v472_v49, %v459_v48 }
  0xad   :  { %v578_v7 = vmul.f32 %v570_v60, %v499_v58  ;;  %vm561_vm2 = vcmp.ge.f32.partialorder %v499_v58, 0.0 }
  0xae   :  { %vm564_vm1 = vcmp.ge.f32.partialorder %v473_v54, 0.0  ;;  %v581_v63 = vmul.f32 %v569_v32, %v473_v54  ;;  %v1857_v32 = vor.u32 %v2112_v27, %v1854_v29 }
  0xaf   :  { %v486_v4 = vpop.f32.mrf.mxu2  ;;  %v586_v18 = vsel %vm561_vm2, %v499_v58, %v578_v7 }
  0xb0   :  { %v589_v3 = vsel %vm564_vm1, %v473_v54, %v581_v63  ;;  %v487_v9 = vadd.f32 %v486_v4, %v110_v55  ;;  %1090 = vmatpush.bf16.msrb.mxu3 %v1857_v32 }
  0xb1   :  { %v593_v8 = vpack.c.bf16 %v589_v3, %v585_v62 }
  0xb2   :  { %v500_v10 = vpop.f32.mrf.mxu3 }
  0xb3   :  { %v501_v14 = vadd.f32 %v500_v10, %v487_v9  ;;  %995 = vmatmul.bf16.vlgmr.msra.gmra.mxu0 %v593_v8  ;;  %v2129_v9 = vld [vmem:[%s3125_s7 + $0x28] sm:$0xff]  ;;  %v2128_v10 = vld [vmem:[%s3125_s7 + $0x20] sm:$0xff] }
  0xb4   :  { %1091 = vmatpush.bf16.msrb.mxu3 %v1849_v38  ;;  %v1105_v38 = vperm.slane %v1099_v33, 0 }
  0xb5   :  { %vm565_vm3 = vcmp.ge.f32.partialorder %v501_v14, 0.0  ;;  %v582_v19 = vmul.f32 %v570_v60, %v501_v14  ;;  %v572_v60 = vperm.slane %v2915_v25, 3  ;;  %v2131_v25 = vld [vmem:[%s3125_s7 + $0x38] sm:$0xff] }
  0xb6   :  { %1251 = vmatpush.bf16.msra.mxu0 %v2131_v25  ;;  %v2147_v25 = vld [vmem:[%s3130_s10 + $0x38] sm:$0xff] }
  0xb7   :  { %v590_v23 = vsel %vm565_vm3, %v501_v14, %v582_v19  ;;  %v2138_v14 = vld [vmem:[%s3125_s7 + $0x70] sm:$0xff]  ;;  %v2135_v19 = vld [vmem:[%s3125_s7 + $0x58] sm:$0xff] }
  0xb8   :  { %v594_v55 = vpack.c.bf16 %v590_v23, %v586_v18  ;;  %1092 = vmatpush.bf16.msrb.mxu3 %v1841_v43  ;;  %v2136_v18 = vld [vmem:[%s3125_s7 + $0x60] sm:$0xff] }
  0xb9   :  { %v661_v23 = vld [vmem:[%s3126_s5] sm:$0x3] }
  0xba   :  { %1009 = vmatmul.bf16.vlgmr.msra.gmra.mxu1 %v594_v55  ;;  %v663_v51 = vperm.slane %v661_v23, 0 }
  0xbb   :  { %1265 = vmatpush.bf16.msra.mxu1 %v2139_v12  ;;  %v2142_v12 = vld [vmem:[%s3130_s10 + $0x10] sm:$0xff] }
  0xbf   :  { %1266 = vmatpush.bf16.msra.mxu1 %v2138_v14  ;;  %v2140_v14 = vld [vmem:[%s3130_s10] sm:$0xff] }
  0xc0   :  { %v512_v37 = vpop.f32.mrf.mxu0 }
  0xc1   :  { %v526_v39 = vpop.f32.mrf.mxu1  ;;  %v513_v42 = vadd.f32 %v512_v37, %v111_v36 }
  0xc3   :  { %1051 = vmatmul.bf16.vlgmr.msrb.gmra.mxu0 %v593_v8  ;;  %v527_v45 = vadd.f32 %v526_v39, %v513_v42  ;;  %v2130_v8 = vld [vmem:[%s3125_s7 + $0x30] sm:$0xff]  ;;  %1267 = vmatpush.bf16.msra.mxu1 %v2137_v16  ;;  %v2148_v16 = vld [vmem:[%s3124_s8] ss:$0 sm:$0xff] }
  0xc4   :  { %1252 = vmatpush.bf16.msra.mxu0 %v2130_v8  ;;  %v2146_v8 = vld [vmem:[%s3130_s10 + $0x30] sm:$0xff] }
  0xc5   :  { %v579_v54 = vmul.f32 %v571_v46, %v527_v45  ;;  %vm562_vm4 = vcmp.ge.f32.partialorder %v527_v45, 0.0 }
  0xc7   :  { %v587_v59 = vsel %vm562_vm4, %v527_v45, %v579_v54  ;;  %1268 = vmatpush.bf16.msra.mxu1 %v2136_v18 }
  0xc8   :  { %v540_v47 = vpop.f32.mrf.mxu2  ;;  %v514_v49 = vpop.f32.mrf.mxu0  ;;  %1253 = vmatpush.bf16.msra.mxu0 %v2129_v9  ;;  %v2145_v9 = vld [vmem:[%s3130_s10 + $0x28] sm:$0xff] }
  0xc9   :  { %v554_v48 = vpop.f32.mrf.mxu3  ;;  %v515_v50 = vadd.f32 %v514_v49, %v111_v36  ;;  %v541_v52 = vadd.f32 %v540_v47, %v112_v44  ;;  %v528_v53 = vpop.f32.mrf.mxu1 }
  0xca   :  { %1065 = vmatmul.bf16.vlgmr.msrb.gmra.mxu1 %v594_v55  ;;  %v2132_v55 = vld [vmem:[%s3125_s7 + $0x40] sm:$0xff] }
  0xcb   :  { %v529_v56 = vadd.f32 %v528_v53, %v515_v50  ;;  %v555_v58 = vadd.f32 %v554_v48, %v541_v52  ;;  %1269 = vmatpush.bf16.msra.mxu1 %v2135_v19 }
  0xcc   :  { %1254 = vmatpush.bf16.msra.mxu0 %v2128_v10  ;;  %v2144_v10 = vld [vmem:[%s3130_s10 + $0x20] sm:$0xff] }
  0xcd   :  { %vm566_vm5 = vcmp.ge.f32.partialorder %v529_v56, 0.0  ;;  %v583_v57 = vmul.f32 %v571_v46, %v529_v56  ;;  %v580_v2 = vmul.f32 %v572_v60, %v555_v58  ;;  %vm563_vm6 = vcmp.ge.f32.partialorder %v555_v58, 0.0 }
  0xce   :  { %v664_v46 = vperm.slane %v661_v23, 1 }
  0xcf   :  { %v591_v61 = vsel %vm566_vm5, %v529_v56, %v583_v57  ;;  %v588_v5 = vsel %vm563_vm6, %v555_v58, %v580_v2  ;;  %1270 = vmatpush.bf16.msra.mxu1 %v2134_v22 }
  0xd0   :  { %v542_v62 = vpop.f32.mrf.mxu2  ;;  %v595_v63 = vpack.c.bf16 %v591_v61, %v587_v59  ;;  %1255 = vmatpush.bf16.msra.mxu0 %v2127_v11  ;;  %v2143_v11 = vld [vmem:[%s3130_s10 + $0x18] sm:$0xff] }
  0xd1   :  { %v543_v0 = vadd.f32 %v542_v62, %v112_v44  ;;  %v556_v1 = vpop.f32.mrf.mxu3 }
  0xd2   :  { %1023 = vmatmul.bf16.vlgmr.msra.gmra.mxu2 %v595_v63 }
  0xd3   :  { %v557_v3 = vadd.f32 %v556_v1, %v543_v0  ;;  %1271 = vmatpush.bf16.msra.mxu1 %v2133_v24  ;;  %1358 = vmatpush.bf16.msra.mxu2 %v2147_v25 }
  0xd4   :  { %1256 = vmatpush.bf16.msra.mxu0 %v2126_v13  ;;  %v2141_v13 = vld [vmem:[%s3130_s10 + $0x8] sm:$0xff] }
  0xd5   :  { %vm567_vm7 = vcmp.ge.f32.partialorder %v557_v3, 0.0  ;;  %v584_v4 = vmul.f32 %v572_v60, %v557_v3 }
  0xd7   :  { %v592_v6 = vsel %vm567_vm7, %v557_v3, %v584_v4  ;;  %1272 = vmatpush.bf16.msra.mxu1 %v2132_v55  ;;  %1359 = vmatpush.bf16.msra.mxu2 %v2146_v8 }
  0xd8   :  { %v596_v7 = vpack.c.bf16 %v592_v6, %v588_v5  ;;  %1257 = vmatpush.bf16.msra.mxu0 %v2125_v15 }
  0xda   :  { %1037 = vmatmul.bf16.vlgmr.msra.gmra.mxu3 %v596_v7 }
  0xdb   :  { %1360 = vmatpush.bf16.msra.mxu2 %v2145_v9 }
  0xdc   :  { %1258 = vmatpush.bf16.msra.mxu0 %v2124_v17 }
  0xdf   :  { %1361 = vmatpush.bf16.msra.mxu2 %v2144_v10 }
  0xe2   :  { %1079 = vmatmul.bf16.vlgmr.msrb.gmra.mxu2 %v595_v63  ;;  %v1106_v63 = vperm.slane %v1099_v33, 1 }
  0xe3   :  { %1362 = vmatpush.bf16.msra.mxu2 %v2143_v11 }
  0xe7   :  { %1363 = vmatpush.bf16.msra.mxu2 %v2142_v12 }
  0xea   :  { %1093 = vmatmul.bf16.vlgmr.msrb.gmra.mxu3 %v596_v7 }
  0xeb   :  { %1364 = vmatpush.bf16.msra.mxu2 %v2141_v13 }
  0xef   :  { %1365 = vmatpush.bf16.msra.mxu2 %v2140_v14 }
 0x130   :  { %v996_v20 = vpop.f32.mrf.mxu0 }
 0x131   :  { %v997_v28 = vadd.f32 %v996_v20, %v663_v51 }
 0x137   :  { %v1010_v21 = vpop.f32.mrf.mxu1 }
 0x138   :  { %v998_v27 = vpop.f32.mrf.mxu0  ;;  %v1011_v31 = vadd.f32 %v1010_v21, %v997_v28  ;;  %v2149_v21 = vld [vmem:[%s3128_s9] ss:$0 sm:$0xff] }
 0x139   :  { %v999_v34 = vadd.f32 %v998_v27, %v663_v51 }
 0x13f   :  { %v1012_v29 = vpop.f32.mrf.mxu1 }
 0x140   :  { %v1013_v36 = vadd.f32 %v1012_v29, %v999_v34  ;;  %v1052_v39 = vpop.f32.mrf.mxu0  ;;  %v2150_v29 = vld [vmem:[%s3129_s11] ss:$0 sm:$0xff] }
 0x141   :  { %v1053_v52 = vadd.f32 %v1052_v39, %v664_v46 }
 0x147   :  { %v1066_v41 = vpop.f32.mrf.mxu1 }
 0x148   :  { %v1054_v53 = vpop.f32.mrf.mxu0  ;;  %v1067_v56 = vadd.f32 %v1066_v41, %v1053_v52 }
 0x149   :  { %v1055_v58 = vadd.f32 %v1054_v53, %v664_v46 }
 0x14f   :  { %v1068_v57 = vpop.f32.mrf.mxu1 }
 0x150   :  { %v1069_v61 = vadd.f32 %v1068_v57, %v1055_v58 }
 0x155   :  { %v1024_v26 = vpop.f32.mrf.mxu2 }
 0x156   :  { %v1025_v35 = vadd.f32 %v1024_v26, %v1011_v31 }
 0x15d   :  { %v1038_v30 = vpop.f32.mrf.mxu3  ;;  %v1026_v32 = vpop.f32.mrf.mxu2 }
 0x15e   :  { %v1039_v37 = vadd.f32 %v1038_v30, %v1025_v35  ;;  %v1027_v40 = vadd.f32 %v1026_v32, %v1013_v36 }
 0x160   :  { %v1109_v43 = vmul.f32 %v1105_v38, %v1039_v37  ;;  %vm1100_vm8 = vcmp.ge.f32.partialorder %v1039_v37, 0.0 }
 0x162   :  { %v1113_v48 = vsel %vm1100_vm8, %v1039_v37, %v1109_v43 }
 0x165   :  { %v1040_v42 = vpop.f32.mrf.mxu3  ;;  %v1080_v45 = vpop.f32.mrf.mxu2 }
 0x166   :  { %v1041_v44 = vadd.f32 %v1040_v42, %v1027_v40  ;;  %v1081_v60 = vadd.f32 %v1080_v45, %v1067_v56 }
 0x168   :  { %vm1102_vm9 = vcmp.ge.f32.partialorder %v1041_v44, 0.0  ;;  %v1111_v47 = vmul.f32 %v1105_v38, %v1041_v44 }
 0x16a   :  { %v1115_v49 = vsel %vm1102_vm9, %v1041_v44, %v1111_v47 }
 0x16b   :  { %v1117_v50 = vpack.c.bf16 %v1115_v49, %v1113_v48 }
 0x16d   :  { %v1094_v54 = vpop.f32.mrf.mxu3  ;;  %1259 = vmatmul.bf16.vlgmr.msra.gmra.mxu0 %v1117_v50  ;;  %v1082_v59 = vpop.f32.mrf.mxu2 }
 0x16e   :  { %v1095_v62 = vadd.f32 %v1094_v54, %v1081_v60  ;;  %v1083_v0 = vadd.f32 %v1082_v59, %v1069_v61 }
 0x170   :  { %v1110_v2 = vmul.f32 %v1106_v63, %v1095_v62  ;;  %vm1101_vm10 = vcmp.ge.f32.partialorder %v1095_v62, 0.0 }
 0x172   :  { %v1114_v5 = vsel %vm1101_vm10, %v1095_v62, %v1110_v2 }
 0x175   :  { %v1096_v1 = vpop.f32.mrf.mxu3 }
 0x176   :  { %v1097_v3 = vadd.f32 %v1096_v1, %v1083_v0 }
 0x178   :  { %vm1103_vm11 = vcmp.ge.f32.partialorder %v1097_v3, 0.0  ;;  %v1112_v4 = vmul.f32 %v1106_v63, %v1097_v3 }
 0x17a   :  { %v1116_v6 = vsel %vm1103_vm11, %v1097_v3, %v1112_v4 }
 0x17b   :  { %v1118_v7 = vpack.c.bf16 %v1116_v6, %v1114_v5 }
 0x17d   :  { %1273 = vmatmul.bf16.vlgmr.msra.gmra.mxu1 %v1118_v7 }
 0x1ea   :  { %v1260_v15 = vpop.f32.mrf.mxu0 }
 0x1eb   :  { %v1261_v18 = vadd.f32 %v2148_v16, %v1260_v15 }
 0x1f2   :  { %v1262_v19 = vpop.f32.mrf.mxu0 }
 0x1f3   :  { %v1263_v22 = vadd.f32 %v2148_v16, %v1262_v19 }
 0x1fa   :  { %v1274_v17 = vpop.f32.mrf.mxu1 }
 0x1fb   :  { %v1275_v20 = vadd.f32 %v1274_v17, %v1261_v18 }
 0x1fd   :  { %v1285_v24 = vmul.f32 %v2149_v21, %v1275_v20  ;;  %vm1280_vm12 = vcmp.ge.f32.partialorder %v1275_v20, 0.0 }
 0x1ff   :  { %v1287_v27 = vsel %vm1280_vm12, %v1275_v20, %v1285_v24 }
 0x202   :  { %v1276_v23 = vpop.f32.mrf.mxu1 }
 0x203   :  { %v1277_v51 = vadd.f32 %v1276_v23, %v1263_v22 }
 0x205   :  { %vm1281_vm13 = vcmp.ge.f32.partialorder %v1277_v51, 0.0  ;;  %v1286_v26 = vmul.f32 %v2149_v21, %v1277_v51 }
 0x207   :  { %v1288_v55 = vsel %vm1281_vm13, %v1277_v51, %v1286_v26 }
 0x208   :  { %v1289_v28 = vpack.c.bf16 %v1288_v55, %v1287_v27 }
 0x20a   :  { %1366 = vmatmul.bf16.vlgmr.msra.gmra.mxu2 %v1289_v28 }
 0x28d   :  { %v1367_v30 = vpop.f32.mrf.mxu2 }
 0x28e   :  { %v1368_v31 = vadd.f32 %v2150_v29, %v1367_v30 }
 0x290   :  { %1372 = vst [vmem:[%s3131_s12] sm:$0xff] %v1368_v31 }
 0x295   :  { %v1369_v32 = vpop.f32.mrf.mxu2 }
 0x296   :  { %v1370_v33 = vadd.f32 %v2150_v29, %v1369_v32 }
 0x298   :  { %1373 = vst [vmem:[%s3131_s12 + $0x8] sm:$0xff] %v1370_v33 }

</bundles_post_ra>
